<compile_context>
chip_gen: v7x
topology: tpu7x:2x2x1
jax: 0.10.0
libtpu: 0.0.40
codegen_flags: <defaults>
</compile_context>

<pallas_src>
import jax
import jax.numpy as jnp
from jax.experimental import pallas as pl
from jax.experimental.pallas import tpu as pltpu


def nsp_head_kernel(x_ref, wt_ref, b_ref, ot_ref):
    # x_ref : [block_b, H]  activation tile (VMEM, double-buffered across grid)
    # wt_ref: [2, H]        weight, PyTorch nn.Linear layout (VMEM, resident)
    # b_ref : [2, 1]        bias column (VMEM, resident)
    # ot_ref: [2, block_b]  transposed, lane-dense output tile
    #
    # "NT" matmul contracting over H: result [2, block_b] keeps the batch
    # dimension on the lane axis so the store below is lane-dense.
    acc = jax.lax.dot_general(
        wt_ref[...], x_ref[...],
        dimension_numbers=(((1,), (1,)), ((), ())),
        preferred_element_type=jnp.float32,
    )  # [2, block_b] f32
    # Single full-tile store with a broadcast bias add (one store per vreg
    # chunk instead of two sublane-masked partial stores).
    ot_ref[...] = (acc + b_ref[...].astype(jnp.float32)).astype(ot_ref.dtype)


def _default_block_b(H, itemsize):
    """Rows per x tile, sized by bytes for the current TPU generation."""
    try:
        kind = jax.devices()[0].device_kind.lower()
    except Exception:  # pragma: no cover - defensive fallback
        kind = ""
    if "v7" in kind:
        tile_bytes = 10 * 1024 * 1024   # pair = 20 MiB, inside 32 MiB scoped / 64 MiB phys per TC
    elif "v6" in kind:
        tile_bytes = 12 * 1024 * 1024   # pair = 24 MiB, inside v6e's 32 MiB scoped default
    else:
        tile_bytes = 6 * 1024 * 1024    # v5e & unknown: pair = 12 MiB, inside 16 MiB scoped default
    rows = tile_bytes // max(1, H * itemsize)
    return max(128, (rows // 128) * 128)


def bert_only_nsp_head(pooled_output, weight, bias, *, block_b=None):
    """pooled_output: [B, H]; weight: [2, H] (PyTorch layout); bias: [2] -> [B, 2]."""
    B, H = pooled_output.shape
    assert weight.shape == (2, H)
    assert bias.shape == (2,)

    if block_b is None:
        block_b = _default_block_b(H, pooled_output.dtype.itemsize)

    if B <= block_b:
        # Single grid step with full-array blocks (exempt from (8,128) rule).
        block_b = B
    else:
        # Tiled path: multiple of 128 so both the x tile (sublanes) and the
        # transposed output tile (lanes) are aligned / lane-dense.
        block_b = max(128, (block_b // 128) * 128)

    # No jnp.pad: cdiv grid + Pallas-masked ragged last block.  OOB input rows
    # of the final block only ever feed output columns whose writes are masked,
    # and nothing reduces across the batch axis inside the kernel.
    grid = (pl.cdiv(B, block_b),)

    bias2d = bias.reshape(2, 1)

    out_t = pl.pallas_call(
        nsp_head_kernel,
        out_shape=jax.ShapeDtypeStruct((2, B), pooled_output.dtype),
        grid_spec=pltpu.PrefetchScalarGridSpec(
            num_scalar_prefetch=0,
            grid=grid,
            in_specs=[
                # x: batch-tiled, double-buffered by the Pallas pipeline.
                pl.BlockSpec((block_b, H), lambda i: (i, 0)),
                # weight: constant block index -> stays VMEM-resident.
                pl.BlockSpec((2, H), lambda i: (0, 0)),
                # bias column: constant block index -> VMEM-resident, broadcast in epilogue.
                pl.BlockSpec((2, 1), lambda i: (0, 0)),
            ],
            # Transposed, lane-dense output tile.
            out_specs=pl.BlockSpec((2, block_b), lambda i: (0, i)),
        ),
        compiler_params=pltpu.CompilerParams(
            # Independent batch tiles -> lets v7x shard the grid over both TCs.
            dimension_semantics=("parallel",),
        ),
    )(pooled_output, weight, bias2d)

    # Un-transpose the tiny lane-dense [2, B] result -> [B, 2].
    return out_t.T


if __name__ == "__main__":
    # Small shapes consistent with the module's forward: batch=2, hidden=32.
    batch, hidden = 2, 32

    key = jax.random.PRNGKey(0)
    k_x, k_w, k_b = jax.random.split(key, 3)

    pooled_output = jax.random.normal(k_x, (batch, hidden), dtype=jnp.float32)

    # nn.Linear-style init; weight kept in PyTorch layout [out_features, in_features].
    bound = 1.0 / (hidden ** 0.5)
    weight = jax.random.uniform(k_w, (2, hidden), dtype=jnp.float32,
                                minval=-bound, maxval=bound)
    bias = jax.random.uniform(k_b, (2,), dtype=jnp.float32,
                              minval=-bound, maxval=bound)

    # 1) Tiny demo shape: single full-array block, one grid step.
    out = bert_only_nsp_head(pooled_output, weight, bias)
    out = jax.block_until_ready(out)
    ref = pooled_output @ weight.T + bias
    assert out.shape == (batch, 2)
    assert jnp.allclose(out, ref, atol=1e-5, rtol=1e-5)

    # 2) Exercise the batch-tiled path with a ragged last block (no wrapper pad):
    #    B2 = 640 with block_b = 256 -> grid of 3, last block only half full.
    B2, H2 = 640, 128
    k_x2 = jax.random.PRNGKey(1)
    x2 = jax.random.normal(k_x2, (B2, H2), dtype=jnp.float32)
    bound2 = 1.0 / (H2 ** 0.5)
    w2 = jax.random.uniform(k_w, (2, H2), dtype=jnp.float32, minval=-bound2, maxval=bound2)
    b2 = jax.random.uniform(k_b, (2,), dtype=jnp.float32, minval=-bound2, maxval=bound2)
    out2 = jax.block_until_ready(bert_only_nsp_head(x2, w2, b2, block_b=256))
    ref2 = x2 @ w2.T + b2
    assert out2.shape == (B2, 2)
    assert jnp.allclose(out2, ref2, atol=1e-4, rtol=1e-4)

    # 3) bf16 activations/weights (halves the dominant HBM traffic), f32 accumulate.
    x3 = x2.astype(jnp.bfloat16)
    w3 = w2.astype(jnp.bfloat16)
    out3 = jax.block_until_ready(bert_only_nsp_head(x3, w3, b2, block_b=256))
    assert out3.shape == (B2, 2)
    assert jnp.allclose(out3.astype(jnp.float32), ref2, atol=5e-2, rtol=5e-2)

    print("KERNEL_OK")
</pallas_src>

<mosaic_0001>
module attributes {stable_mosaic.version = 11 : i64} {
  func.func @nsp_head_kernel(%arg0: i32, %arg1: memref<2x32xf32, #tpu.memory_space<vmem>>, %arg2: memref<2x32xf32, #tpu.memory_space<vmem>>, %arg3: memref<2x1xf32, #tpu.memory_space<vmem>>, %arg4: memref<2x2xf32, #tpu.memory_space<vmem>>) attributes {dimension_semantics = [#tpu.dimension_semantics<parallel>], iteration_bounds = array<i64: 1>, scalar_prefetch = 0 : i64, scratch_operands = 0 : i64, tpu.core_type = #tpu.core_type<tc>, window_params = [{transform_indices = @transform_0, window_bounds = array<i64: 2, 32>}, {pipeline_mode = #tpu.pipeline_mode<synchronous>, transform_indices = @transform_1, window_bounds = array<i64: 2, 32>}, {pipeline_mode = #tpu.pipeline_mode<synchronous>, transform_indices = @transform_2, window_bounds = array<i64: 2, 1>}, {transform_indices = @transform_3, window_bounds = array<i64: 2, 2>}]} {
    %c0 = arith.constant 0 : index
    %c0_0 = arith.constant 0 : index
    %0 = vector.load %arg2[%c0, %c0_0] : memref<2x32xf32, #tpu.memory_space<vmem>>, vector<2x32xf32>
    %c0_1 = arith.constant 0 : index
    %c0_2 = arith.constant 0 : index
    %1 = vector.load %arg1[%c0_1, %c0_2] : memref<2x32xf32, #tpu.memory_space<vmem>>, vector<2x32xf32>
    %cst = arith.constant dense<0.000000e+00> : vector<2x2xf32>
    %2 = tpu.matmul %0, %1, %cst {dimension_numbers = #tpu.dot_dimension_numbers<[1], [1], [0], [0], [0, 0, 1, 0], [], []>} : vector<2x32xf32>, vector<2x32xf32>, vector<2x2xf32> -> vector<2x2xf32>
    %c0_3 = arith.constant 0 : index
    %c0_4 = arith.constant 0 : index
    %3 = vector.load %arg3[%c0_3, %c0_4] : memref<2x1xf32, #tpu.memory_space<vmem>>, vector<2x1xf32>
    %4 = vector.broadcast %3 : vector<2x1xf32> to vector<2x2xf32>
    %5 = arith.addf %2, %4 : vector<2x2xf32>
    %c0_5 = arith.constant 0 : index
    %c0_6 = arith.constant 0 : index
    %6 = vector.load %arg4[%c0_5, %c0_6] : memref<2x2xf32, #tpu.memory_space<vmem>>, vector<2x2xf32>
    tpu.vector_store %arg4[%c0_5, %c0_6], %5 {strides = array<i32>} : memref<2x2xf32, #tpu.memory_space<vmem>>, vector<2x2xf32>,
    return
  }
  func.func @transform_0(%arg0: i32) -> (i32, i32) {
    %c0_i32 = arith.constant 0 : i32
    %c0_i32_0 = arith.constant 0 : i32
    return %arg0, %c0_i32 : i32, i32
  }
  func.func @transform_1(%arg0: i32) -> (i32, i32) {
    %c0_i32 = arith.constant 0 : i32
    %c0_i32_0 = arith.constant 0 : i32
    %c0_i32_1 = arith.constant 0 : i32
    return %c0_i32, %c0_i32_0 : i32, i32
  }
  func.func @transform_2(%arg0: i32) -> (i32, i32) {
    %c0_i32 = arith.constant 0 : i32
    %c0_i32_0 = arith.constant 0 : i32
    %c0_i32_1 = arith.constant 0 : i32
    return %c0_i32, %c0_i32_0 : i32, i32
  }
  func.func @transform_3(%arg0: i32) -> (i32, i32) {
    %c0_i32 = arith.constant 0 : i32
    %c0_i32_0 = arith.constant 0 : i32
    return %c0_i32, %arg0 : i32, i32
  }
}

</mosaic_0001>

<bundles_post_ra>
// kernel: tpu_custom_call.1
= control target key start
LH: loop header
LB: loop body
LE: loop exit
PB: predicated region body
PF: predicated region fallthrough
CT: control target
= control target key end

     0   :  { %vm23_vm0 = vcmask 261120   ;;  %v154_v1 = vmov 0.0   ;;  %vm155_vm1 = vmmov 0   ;;  %s199_s0 = inlined_call_operand.vmem [shape: f32[2,32], index: 0, kind: input, shape index: {}]   ;;  %s200_s1 = inlined_call_operand.vmem [shape: f32[2,32], index: 1, kind: input, shape index: {}]   ;;  %s201_s2 = inlined_call_operand.vmem [shape: f32[2,1], index: 2, kind: input, shape index: {}]   ;;  %s202_s3 = inlined_call_operand.hbm [shape: f32[2,2], index: 3, kind: output, shape index: {}]  }
   0x1   :  { %v16_v0 = vld [vmem:[%s199_s0] sm:$0x3]  ;;  %120 = vmatprep.subr.mxu0 %v154_v1  ;;  %122 = vmatprep.mubr.msk.f32.mxu0 %vm155_vm1, %v154_v1 }
   0x2   :  { %v17_v2 = vld [vmem:[%s201_s2] sm:$0x3] }
   0x3   :  { %8 = vsyncpa [#allocation3], 0  ;;  %121 = vmatpush3.xpose.msk.msra.mxu0 %vm23_vm0, %v16_v0  ;;  %v15_v3 = vld [vmem:[%s200_s1] sm:$0x3]  ;;  %v156_v4 = vmov 0   ;;  %s157_s0 = smov [#allocation2]  }
   0x4   :  { %129 = vset.pattern.permute.xlu0 %v156_v4  ;;  %s108_s18 = sshll.u32 %s157_s0, 4  ;;  %vm100_vm2 = vcmask 9216   ;;  %s109_s18 = int_to_ptr.vmem [resolvable:$true] %s108_s18 }
   0x5   :  { %20 = vperm.xlu0 %129, %v17_v2   ;;  %s130_s2 = scalar_lea.vmem %s109_s18, 32  ;;  %p135_p1 = scmp.lt.s32.totalorder %s109_s18, %s109_s18 }
   0x6   :  { %123 = vmatmul.mubr.msk.f32.vlgmr.msra.gmra.mrb[0].mxu0 %vm23_vm0, %v15_v3  ;;  %p131_p0 = scmp.ne.s32.totalorder %s109_s18, %s130_s2  ;;  %p136_p2 = scmp.lt.s32.totalorder %s130_s2, %s130_s2 }
   0x8   :  { %p137_p3 = por %p136_p2, %p135_p1 }
   0xa   :  { %p138_p4 = pnand %p137_p3, %p131_p0 }
  0x84   :  { %v21_v5 = vpop.permute.xlu0 %20 }
  0xd9   :  { %v96_v6 = vpop.f32.mrb[0].mxu0 }
  0xda   :  { %v97_v7 = vadd.f32 %v96_v6, %v21_v5  ;;  %v124_v8 = vpop.f32.mrb[1].mxu0 }
  0xdc   :  { %101 = vst.msk [vmem:[#allocation2] sm:$0x3] %vm100_vm2, %v97_v7 }
  0xdd   :  { %141 = shalt.err (!%p138_p4)
}
  0xde   :  { %s142_s20 = scalar_lea.hbm %s202_s3, 32 }
  0xdf   :  { %p143_p5 = scmp.ne.s32.totalorder %s202_s3, %s142_s20  ;;  %p146_p6 = scmp.lt.u32.totalorder %s142_s20, %s202_s3 }
  0xe1   :  { %p148_p7 = pnand %p146_p6, %p143_p5 }
  0xe3   :  { %151 = shalt.err (!%p148_p7)
}
  0xe4   :  { %111 = dma.vmem_to_hbm [thread:$0]  %s109_s18, 32, %s202_s3, [#allocation3]  }
  0xe5   :  { %152 = dma.done.wait [#allocation3], 32  }
  0xe6   :  { %153 = vsyncadd [#allocation3], 4294967264 }
  0xe7   :  { %115 = vsyncpa [#allocation3], 1 }

</bundles_post_ra>
